<compile_context>
chip_gen: v7x
topology: tpu7x:2x2x1
jax: 0.10.0
libtpu: 0.0.40
codegen_flags: <defaults>
</compile_context>

<pallas_src>
import math
import functools

import jax
import jax.numpy as jnp
from jax.experimental import pallas as pl
from jax.experimental.pallas import tpu as pltpu

_LANE = 128
_INV_SQRT2 = 1.0 / math.sqrt(2.0)


def _round_up(a, b):
    return ((a + b - 1) // b) * b


def _cdiv(a, b):
    return (a + b - 1) // b


def _vmem_capacity_bytes():
    """Per-core VMEM capacity; conservative 64 MiB fallback (v7x per-TC)."""
    try:
        info = pltpu.get_tpu_info()
        cap = int(getattr(info, "vmem_capacity_bytes", 0) or 0)
        if cap > 0:
            return cap
    except Exception:
        pass
    return 64 * 1024 * 1024


def _gelu(h, approximate):
    if approximate:
        # tanh GELU -> EUP slot (cheap on v6e/v7x); small numeric delta.
        return jax.nn.gelu(h, approximate=True)
    # Exact erf GELU (torch.nn.functional.gelu default).
    return 0.5 * h * (1.0 + jax.lax.erf(h * _INV_SQRT2))


# ----------------------------------------------------------------- kernels

def _mlp_resident_kernel(approximate_gelu, x_ref, w1_ref, b1_ref, w2_ref,
                         b2_ref, o_ref):
    # Weights fully VMEM-resident (constant index_map -> DMA'd from HBM once).
    # x_ref: (tm, Hp) bf16, w1_ref: (Hp, H4p) bf16, w2_ref: (H4p, Hp) bf16.
    h = jnp.dot(x_ref[...], w1_ref[...], preferred_element_type=jnp.float32)
    h = _gelu(h + b1_ref[...], approximate_gelu)
    y = jnp.dot(h.astype(jnp.bfloat16), w2_ref[...],
                preferred_element_type=jnp.float32)
    o_ref[...] = (y + b2_ref[...]).astype(o_ref.dtype)


def _mlp_tiled_kernel(approximate_gelu, x_ref, w1_ref, b1_ref, w2_ref, b2_ref,
                      o_ref, acc_ref):
    # Grid axis 1 tiles fc1's output columns == fc2's K reduction.
    # x_ref : (tm, Hp)   bf16 row tile (resident across the 4H axis)
    # w1_ref: (Hp, tn4)  bf16 fc1 weight column slice
    # w2_ref: (tn4, Hp)  bf16 fc2 weight K-slice
    # acc_ref: (tm, Hp)  f32 VMEM accumulator
    j = pl.program_id(1)

    h = jnp.dot(x_ref[...], w1_ref[...], preferred_element_type=jnp.float32)
    h = _gelu(h + b1_ref[...], approximate_gelu)
    partial = jnp.dot(h.astype(jnp.bfloat16), w2_ref[...],
                      preferred_element_type=jnp.float32)

    @pl.when(j == 0)
    def _():
        acc_ref[...] = partial            # direct write: no zero-fill pass

    @pl.when(j > 0)
    def _():
        acc_ref[...] += partial

    @pl.when(j == pl.num_programs(1) - 1)
    def _():
        o_ref[...] = (acc_ref[...] + b2_ref[...]).astype(o_ref.dtype)


# ----------------------------------------------------------------- wrapper

def make_mlp(w1, b1, w2, b2, *, out_dtype=None, approximate_gelu=False):
    """Plan tiling once, pad+cast weights once, return a jitted apply(x).

    w1: (H, 4H) = fc1.weight.T   b1: (4H,)
    w2: (4H, H) = fc2.weight.T   b2: (H,)
    """
    H, H4 = w1.shape
    assert w2.shape == (H4, H) and b1.shape == (H4,) and b2.shape == (H,)

    vmem_cap = _vmem_capacity_bytes()
    budget = int(0.75 * vmem_cap)           # leave headroom for compiler scratch

    H_pad = _round_up(H, _LANE)
    H4_full = _round_up(H4, _LANE)

    # Weight-resident when bf16 W1+W2 (budgeted double-buffered) fit in half
    # the VMEM budget -> each weight is fetched from HBM exactly once.
    resident_w_bytes = 2 * 2 * (H_pad * H4_full * 2)
    weight_resident = resident_w_bytes <= budget // 2
    if weight_resident:
        tn4 = H4_full
    else:
        tn4 = 512 if H4_full >= 512 else H4_full   # 256-aligned MXU slices
    H4_pad = _round_up(H4, tn4)
    n_j = H4_pad // tn4

    # ---- pad + cast the weights ONCE (hoisted out of the per-call path).
    f32 = jnp.float32
    w1p = jnp.pad(jnp.asarray(w1, f32),
                  ((0, H_pad - H), (0, H4_pad - H4))).astype(jnp.bfloat16)
    w2p = jnp.pad(jnp.asarray(w2, f32),
                  ((0, H4_pad - H4), (0, H_pad - H))).astype(jnp.bfloat16)
    b1p = jnp.pad(jnp.asarray(b1, f32), (0, H4_pad - H4)).reshape(1, H4_pad)
    b2p = jnp.pad(jnp.asarray(b2, f32), (0, H_pad - H)).reshape(1, H_pad)

    # Per-row-tile VMEM estimate (double-buffered pipeline copies).
    def _bytes_for(tm, out_bytes):
        return (2 * (H_pad * tn4 + tn4 * H_pad) * 2   # W1/W2 slices, bf16, 2 bufs
                + 2 * (tn4 + H_pad) * 4               # biases, f32, 2 bufs
                + 2 * tm * H_pad * 2                  # x tile, bf16, 2 bufs
                + 2 * tm * H_pad * out_bytes          # out tile, 2 bufs
                + tm * H_pad * 4                      # f32 accumulator scratch
                + 2 * tm * tn4 * 4)                   # fc1 intermediate headroom

    # Generation-aware row tile: in the tiled path weights are re-streamed once
    # per row tile, so tm sets FLOPs/byte of the weight stream (need ~700+ on
    # v6e, ~310+ on v7x). Use VMEM capacity as the generation proxy.
    tm_target = 512 if vmem_cap <= 72 * 1024 * 1024 else 1024

    def _plan_rows(M, out_bytes):
        tm = tm_target
        while tm > 128 and _bytes_for(tm, out_bytes) > budget:
            tm -= 128
        while tm > 8 and _bytes_for(tm, out_bytes) > budget:
            tm -= 8
        tm = max(8, tm)
        if M <= 8:
            return _round_up(max(M, 1), 8), 1
        tm = min(tm, _round_up(M, 8))
        n_rows = max(2, _cdiv(M, tm))          # >=2 row tiles -> both v7x TCs
        tm = _round_up(_cdiv(M, n_rows), 8)
        n_rows = _cdiv(M, tm)
        return tm, n_rows

    @jax.jit
    def apply(x):
        B, N, Hx = x.shape
        assert Hx == H, "channel mismatch"
        out_dt = jnp.dtype(out_dtype) if out_dtype is not None else x.dtype
        M = B * N
        tm, n_rows = _plan_rows(M, out_dt.itemsize)
        M_pad = tm * n_rows

        x2d = jnp.pad(x.reshape(M, H).astype(jnp.bfloat16),
                      ((0, M_pad - M), (0, H_pad - H)))

        est = _bytes_for(tm, out_dt.itemsize)
        vmem_limit = int(min(max(int(1.15 * est), 16 * 1024 * 1024),
                             int(0.85 * vmem_cap)))

        if weight_resident:
            kernel = functools.partial(_mlp_resident_kernel, approximate_gelu)
            out = pl.pallas_call(
                kernel,
                out_shape=jax.ShapeDtypeStruct((M_pad, H_pad), out_dt),
                grid_spec=pltpu.PrefetchScalarGridSpec(
                    num_scalar_prefetch=0,
                    grid=(n_rows,),
                    in_specs=[
                        pl.BlockSpec((tm, H_pad), lambda i: (i, 0)),      # x
                        pl.BlockSpec((H_pad, H4_pad), lambda i: (0, 0)),  # W1
                        pl.BlockSpec((1, H4_pad), lambda i: (0, 0)),      # b1
                        pl.BlockSpec((H4_pad, H_pad), lambda i: (0, 0)),  # W2
                        pl.BlockSpec((1, H_pad), lambda i: (0, 0)),       # b2
                    ],
                    out_specs=pl.BlockSpec((tm, H_pad), lambda i: (i, 0)),
                ),
                compiler_params=pltpu.CompilerParams(
                    dimension_semantics=("parallel",),
                    vmem_limit_bytes=vmem_limit,
                ),
            )(x2d, w1p, b1p, w2p, b2p)
        else:
            kernel = functools.partial(_mlp_tiled_kernel, approximate_gelu)
            out = pl.pallas_call(
                kernel,
                out_shape=jax.ShapeDtypeStruct((M_pad, H_pad), out_dt),
                grid_spec=pltpu.PrefetchScalarGridSpec(
                    num_scalar_prefetch=0,
                    grid=(n_rows, n_j),
                    in_specs=[
                        pl.BlockSpec((tm, H_pad), lambda i, j: (i, 0)),   # x
                        pl.BlockSpec((H_pad, tn4), lambda i, j: (0, j)),  # W1 col
                        pl.BlockSpec((1, tn4), lambda i, j: (0, j)),      # b1
                        pl.BlockSpec((tn4, H_pad), lambda i, j: (j, 0)),  # W2 K
                        pl.BlockSpec((1, H_pad), lambda i, j: (0, 0)),    # b2
                    ],
                    out_specs=pl.BlockSpec((tm, H_pad), lambda i, j: (i, 0)),
                    scratch_shapes=[pltpu.VMEM((tm, H_pad), jnp.float32)],
                ),
                compiler_params=pltpu.CompilerParams(
                    dimension_semantics=("parallel", "arbitrary"),
                    vmem_limit_bytes=vmem_limit,
                ),
            )(x2d, w1p, b1p, w2p, b2p)

        return out[:M, :H].reshape(B, N, H)

    return apply


def mlp_pallas(x, w1, b1, w2, b2, **kwargs):
    """One-shot convenience wrapper (prefer make_mlp to reuse prepared weights)."""
    return make_mlp(w1, b1, w2, b2, **kwargs)(x)


# --------------------------------------------------------------- reference

def init_mlp_params(key, hidden_size):
    """Deterministic init matching nn.Linear shapes (stored transposed)."""
    h, h4 = hidden_size, 4 * hidden_size
    k1, k2, k3, k4 = jax.random.split(key, 4)
    bound1 = 1.0 / math.sqrt(h)
    bound2 = 1.0 / math.sqrt(h4)
    w1 = jax.random.uniform(k1, (h, h4), jnp.float32, -bound1, bound1)   # fc1.weight.T
    b1 = jax.random.uniform(k2, (h4,), jnp.float32, -bound1, bound1)     # fc1.bias
    w2 = jax.random.uniform(k3, (h4, h), jnp.float32, -bound2, bound2)   # fc2.weight.T
    b2 = jax.random.uniform(k4, (h,), jnp.float32, -bound2, bound2)      # fc2.bias
    return w1, b1, w2, b2


def mlp_reference(x, w1, b1, w2, b2):
    h = x @ w1 + b1
    h = jax.nn.gelu(h, approximate=False)
    return h @ w2 + b2


if __name__ == "__main__":
    key = jax.random.PRNGKey(0)
    kx, kp = jax.random.split(key)

    B, N, H = 2, 8, 32          # batch=2, seq=8, hidden=32
    x = jax.random.normal(kx, (B, N, H), jnp.float32)
    w1, b1, w2, b2 = init_mlp_params(kp, H)

    mlp = make_mlp(w1, b1, w2, b2)   # weights padded/cast once here
    out = jax.block_until_ready(mlp(x))
    ref = mlp_reference(x, w1, b1, w2, b2)

    assert out.shape == (B, N, H)
    # bf16 MXU operands with f32 accumulation -> relaxed tolerance vs f32 ref.
    assert jnp.allclose(out, ref, atol=5e-2, rtol=5e-2), "mismatch vs reference"

    print("KERNEL_OK")
</pallas_src>

<mosaic_0001>
module attributes {stable_mosaic.version = 11 : i64} {
  func.func @_mlp_resident_kernel(%arg0: i32, %arg1: memref<8x128xbf16, #tpu.memory_space<vmem>>, %arg2: memref<128x128xbf16, #tpu.memory_space<vmem>>, %arg3: memref<1x128xf32, #tpu.memory_space<vmem>>, %arg4: memref<128x128xbf16, #tpu.memory_space<vmem>>, %arg5: memref<1x128xf32, #tpu.memory_space<vmem>>, %arg6: memref<8x128xf32, #tpu.memory_space<vmem>>) attributes {dimension_semantics = [#tpu.dimension_semantics<parallel>], iteration_bounds = array<i64: 2>, scalar_prefetch = 0 : i64, scratch_operands = 0 : i64, tpu.core_type = #tpu.core_type<tc>, window_params = [{transform_indices = @transform_0, window_bounds = array<i64: 8, 128>}, {pipeline_mode = #tpu.pipeline_mode<synchronous>, transform_indices = @transform_1, window_bounds = array<i64: 128, 128>}, {pipeline_mode = #tpu.pipeline_mode<synchronous>, transform_indices = @transform_2, window_bounds = array<i64: 1, 128>}, {pipeline_mode = #tpu.pipeline_mode<synchronous>, transform_indices = @transform_3, window_bounds = array<i64: 128, 128>}, {pipeline_mode = #tpu.pipeline_mode<synchronous>, transform_indices = @transform_4, window_bounds = array<i64: 1, 128>}, {transform_indices = @transform_5, window_bounds = array<i64: 8, 128>}]} {
    %c0 = arith.constant 0 : index
    %c0_0 = arith.constant 0 : index
    %0 = vector.load %arg1[%c0, %c0_0] : memref<8x128xbf16, #tpu.memory_space<vmem>>, vector<8x128xbf16>
    %c0_1 = arith.constant 0 : index
    %c0_2 = arith.constant 0 : index
    %1 = vector.load %arg2[%c0_1, %c0_2] : memref<128x128xbf16, #tpu.memory_space<vmem>>, vector<128x128xbf16>
    %cst = arith.constant dense<0.000000e+00> : vector<8x128xf32>
    %2 = tpu.matmul %0, %1, %cst {dimension_numbers = #tpu.dot_dimension_numbers<[1], [0], [0], [1], [0, 0, 1, 1], [], []>} : vector<8x128xbf16>, vector<128x128xbf16>, vector<8x128xf32> -> vector<8x128xf32>
    %c0_3 = arith.constant 0 : index
    %c0_4 = arith.constant 0 : index
    %3 = vector.load %arg3[%c0_3, %c0_4] : memref<1x128xf32, #tpu.memory_space<vmem>>, vector<1x128xf32>
    %4 = vector.broadcast %3 : vector<1x128xf32> to vector<8x128xf32>
    %5 = arith.addf %2, %4 : vector<8x128xf32>
    %cst_5 = arith.constant 5.000000e-01 : f32
    %6 = vector.broadcast %cst_5 : f32 to vector<8x128xf32>
    %7 = arith.mulf %6, %5 : vector<8x128xf32>
    %cst_6 = arith.constant 0.707106769 : f32
    %8 = vector.broadcast %cst_6 : f32 to vector<8x128xf32>
    %9 = arith.mulf %5, %8 : vector<8x128xf32>
    %10 = math.erf %9 : vector<8x128xf32>
    %cst_7 = arith.constant 1.000000e+00 : f32
    %11 = vector.broadcast %cst_7 : f32 to vector<8x128xf32>
    %12 = arith.addf %11, %10 : vector<8x128xf32>
    %13 = arith.mulf %7, %12 : vector<8x128xf32>
    %14 = arith.truncf %13 : vector<8x128xf32> to vector<8x128xbf16>
    %c0_8 = arith.constant 0 : index
    %c0_9 = arith.constant 0 : index
    %15 = vector.load %arg4[%c0_8, %c0_9] : memref<128x128xbf16, #tpu.memory_space<vmem>>, vector<128x128xbf16>
    %cst_10 = arith.constant dense<0.000000e+00> : vector<8x128xf32>
    %16 = tpu.matmul %14, %15, %cst_10 {dimension_numbers = #tpu.dot_dimension_numbers<[1], [0], [0], [1], [0, 0, 1, 1], [], []>} : vector<8x128xbf16>, vector<128x128xbf16>, vector<8x128xf32> -> vector<8x128xf32>
    %c0_11 = arith.constant 0 : index
    %c0_12 = arith.constant 0 : index
    %17 = vector.load %arg5[%c0_11, %c0_12] : memref<1x128xf32, #tpu.memory_space<vmem>>, vector<1x128xf32>
    %18 = vector.broadcast %17 : vector<1x128xf32> to vector<8x128xf32>
    %19 = arith.addf %16, %18 : vector<8x128xf32>
    %c0_13 = arith.constant 0 : index
    %c0_14 = arith.constant 0 : index
    %20 = vector.load %arg6[%c0_13, %c0_14] : memref<8x128xf32, #tpu.memory_space<vmem>>, vector<8x128xf32>
    tpu.vector_store %arg6[%c0_13, %c0_14], %19 {strides = array<i32>} : memref<8x128xf32, #tpu.memory_space<vmem>>, vector<8x128xf32>,
    return
  }
  func.func @transform_0(%arg0: i32) -> (i32, i32) {
    %c0_i32 = arith.constant 0 : i32
    %c0_i32_0 = arith.constant 0 : i32
    return %arg0, %c0_i32 : i32, i32
  }
  func.func @transform_1(%arg0: i32) -> (i32, i32) {
    %c0_i32 = arith.constant 0 : i32
    %c0_i32_0 = arith.constant 0 : i32
    %c0_i32_1 = arith.constant 0 : i32
    return %c0_i32, %c0_i32_0 : i32, i32
  }
  func.func @transform_2(%arg0: i32) -> (i32, i32) {
    %c0_i32 = arith.constant 0 : i32
    %c0_i32_0 = arith.constant 0 : i32
    %c0_i32_1 = arith.constant 0 : i32
    return %c0_i32, %c0_i32_0 : i32, i32
  }
  func.func @transform_3(%arg0: i32) -> (i32, i32) {
    %c0_i32 = arith.constant 0 : i32
    %c0_i32_0 = arith.constant 0 : i32
    %c0_i32_1 = arith.constant 0 : i32
    return %c0_i32, %c0_i32_0 : i32, i32
  }
  func.func @transform_4(%arg0: i32) -> (i32, i32) {
    %c0_i32 = arith.constant 0 : i32
    %c0_i32_0 = arith.constant 0 : i32
    %c0_i32_1 = arith.constant 0 : i32
    return %c0_i32, %c0_i32_0 : i32, i32
  }
  func.func @transform_5(%arg0: i32) -> (i32, i32) {
    %c0_i32 = arith.constant 0 : i32
    %c0_i32_0 = arith.constant 0 : i32
    return %arg0, %c0_i32 : i32, i32
  }
}

</mosaic_0001>

<bundles_post_ra>
// kernel: apply.1
= control target key start
LH: loop header
LB: loop body
LE: loop exit
PB: predicated region body
PF: predicated region fallthrough
CT: control target
= control target key end

     0   :  { %10 = vsyncpa [#allocation3], 0  ;;  %s734_s18 = smov 0   ;;  %s824_s0 = inlined_call_operand.vmem [shape: bf16[16,128], index: 0, kind: input, shape index: {}]   ;;  %s825_s1 = inlined_call_operand.hbm [shape: bf16[128,128], index: 1, kind: input, shape index: {}]   ;;  %s826_s2 = inlined_call_operand.vmem [shape: f32[1,128], index: 2, kind: input, shape index: {}]   ;;  %s827_s3 = inlined_call_operand.vmem [shape: bf16[128,128], index: 3, kind: input, shape index: {}]   ;;  %s828_s4 = inlined_call_operand.vmem [shape: f32[1,128], index: 4, kind: input, shape index: {}]   ;;  %s829_s5 = inlined_call_operand.vmem [shape: f32[16,128], index: 5, kind: output, shape index: {}]  }
   0x1 LB: > { %s740_s19 = sadd.s32 4294967295, %s697_s18   ;;  %p533_p0 = scmp.ge.s32.totalorder %s697_s18, 1  ;;  %s697_s18 = sphi %s734_s18, %s16_s18  }
   0x2   : > { %p157_p1 = scmp.lt.s32.totalorder %s697_s18, 3  ;;  %s699_s20 = smov [#allocation2]  }
   0x3   : > { %s169_s21 = sshll.u32 %s699_s20, 4  ;;  %p830_p3 = scmp.eq.s32.totalorder %s740_s19, 0  ;;  %s170_s21 = int_to_ptr.vmem [resolvable:$true] %s169_s21 }
   0x4   : > { %p744_p2 = pnand %p533_p0, %p157_p1  ;;  %s659_s26 = scalar_lea.hbm %s825_s1, 1024 }
   0x5   : > { %p660_p6 = scmp.ne.s32.totalorder %s825_s1, %s659_s26  ;;  %p666_p10 = scmp.lt.u32.totalorder %s659_s26, %s825_s1 }
   0x6   : > { %s832_s22 = scalar_select %p744_p2, 1, 0 }
   0x7   : > { %p622_p4 = pneg %p744_p2 }
   0x9   : > { %p753_p5 = pnand %p830_p3, %p622_p4 }
   0xb   : > { %p661_p7 = pneg %p753_p5 }
   0xd   : > { %p662_p8 = pnand %p661_p7, %p660_p6 }
   0xf   : > { %p663_p9 = pneg %p662_p8 }
  0x11   : > { %p668_p11 = pnand %p666_p10, %p663_p9 }
  0x13   : > { %671 = shalt.err (!%p668_p11)
}
  0x14   : > { %s672_s6 = scalar_lea.vmem %s170_s21, 1024  ;;  %p680_p1 = scmp.lt.s32.totalorder %s170_s21, %s170_s21 }
  0x15   : > { %p673_p12 = scmp.ne.s32.totalorder %s170_s21, %s672_s6  ;;  %p681_p4 = scmp.lt.s32.totalorder %s672_s6, %s672_s6 }
  0x17   : > { %p675_p13 = pnand %p673_p12, %p661_p7  ;;  %p682_p3 = por %p681_p4, %p680_p1 }
  0x19   : > { %p676_p0 = pneg %p675_p13 }
  0x1b   : > { %p683_p2 = pnand %p682_p3, %p676_p0 }
  0x1d   : > { %686 = shalt.err (!%p683_p2)
}
  0x1e   : > { %s700_s7 = smov 64   ;;  %s701_s8 = smov 4  }
  0x1f   : > { %625 = dma.hbm_to_vmem [thread:$0]  (!%p753_p5), %s825_s1, 1024, %s170_s21, [#allocation3], %s700_s7, %s700_s7, %s701_s8  }
  0x20   : > { %p834_p6 = scmp.ne.s32.totalorder %s832_s22, 0 }
  0x21   : > { %p835_p8 = scmp.eq.s32.totalorder (!%p834_p6), %s740_s19, 0 }
  0x22   : > { %201 = sbr.rel (%p834_p6) target bundleno = 524 (0x20c), region = 40 }
  0x29   : > { %692 = dma.done.wait (%p835_p8), [#allocation3], 1024   ;;  %p836_p7 = pmov %p835_p8 }
  0x2a   : > { %v702_v0 = vmov 0.0   ;;  %vm703_vm0 = vmmov 0   ;;  %v641_v1 = vld [vmem:[#allocation2] sm:$0xff]   ;;  %v642_v2 = vld [vmem:[#allocation2 + $0x8] sm:$0xff]   ;;  %v643_v3 = vld [vmem:[#allocation2 + $0x10] sm:$0xff]   ;;  %p227_p2 = scmp.lt.s32.totalorder %s740_s19, 1 }
  0x2b   : > { %694 = vsyncadd (%p836_p7), [#allocation3], 4294966272  ;;  %578 = vmatprep.subr.bf16.mxu0 %v702_v0  ;;  %594 = vmatprep.mubr.msk.bf16.mxu0 %vm703_vm0, %v702_v0  ;;  %v649_v4 = vld [vmem:[%s827_s3] sm:$0xff]   ;;  %v644_v5 = vld [vmem:[#allocation2 + $0x18] sm:$0xff]  }
  0x2c   : > { %598 = vmatprep.subr.bf16.mxu1 %v702_v0  ;;  %614 = vmatprep.mubr.msk.bf16.mxu1 %vm703_vm0, %v702_v0  ;;  %v650_v6 = vld [vmem:[%s827_s3 + $0x8] sm:$0xff]   ;;  %v645_v7 = vld [vmem:[#allocation2 + $0x20] sm:$0xff]   ;;  %v651_v8 = vld [vmem:[%s827_s3 + $0x10] sm:$0xff]   ;;  %s838_s19 = smov (!%p227_p2, %s740_s19), 1 }
  0x2d   : > { %579 = vmatpush3.bf16.msra.mxu0 %v641_v1  ;;  %599 = vmatpush3.bf16.msra.mxu1 %v649_v4  ;;  %v646_v9 = vld [vmem:[#allocation2 + $0x28] sm:$0xff]   ;;  %v647_v10 = vld [vmem:[#allocation2 + $0x30] sm:$0xff]   ;;  %s538_s17 = sshll.u32 %s838_s19, 2  ;;  %v648_v11 = vld [vmem:[#allocation2 + $0x38] sm:$0xff]   ;;  %s539_s10 = sshll.u32 %s838_s19, 3 }
  0x2e   : > { %580 = vmatprep.subr.bf16.mxu0 %v702_v0  ;;  %600 = vmatprep.subr.bf16.mxu1 %v702_v0  ;;  %s230_s22 = scalar_lea.vmem %s824_s0, %s538_s17  ;;  %v652_v13 = vld [vmem:[%s827_s3 + $0x18] sm:$0xff]   ;;  %v653_v14 = vld [vmem:[%s827_s3 + $0x20] sm:$0xff]   ;;  %v654_v15 = vld [vmem:[%s827_s3 + $0x28] sm:$0xff]   ;;  %s234_s15 = scalar_lea.vmem %s829_s5, %s539_s10 }
  0x2f   : > { %v236_v12 = vld [vmem:[%s230_s22] sm:$0xf]  ;;  %v655_v16 = vld [vmem:[%s827_s3 + $0x30] sm:$0xff]   ;;  %v656_v17 = vld [vmem:[%s827_s3 + $0x38] sm:$0xff]  }
  0x30   : > { %v540_v18 = vld [vmem:[%s826_s2] ss:$0 sm:$0xff] }
  0x31   : > { %581 = vmatpush3.bf16.msra.mxu0 %v642_v2  ;;  %601 = vmatpush3.bf16.msra.mxu1 %v650_v6  ;;  %v549_v30 = vld [vmem:[%s828_s4] ss:$0 sm:$0xff] }
  0x32   : > { %582 = vmatprep.subr.bf16.mxu0 %v702_v0  ;;  %602 = vmatprep.subr.bf16.mxu1 %v702_v0 }
  0x35   : > { %583 = vmatpush3.bf16.msra.mxu0 %v643_v3  ;;  %603 = vmatpush3.bf16.msra.mxu1 %v651_v8 }
  0x36   : > { %584 = vmatprep.subr.bf16.mxu0 %v702_v0  ;;  %604 = vmatprep.subr.bf16.mxu1 %v702_v0 }
  0x39   : > { %585 = vmatpush3.bf16.msra.mxu0 %v644_v5  ;;  %605 = vmatpush3.bf16.msra.mxu1 %v652_v13 }
  0x3a   : > { %586 = vmatprep.subr.bf16.mxu0 %v702_v0  ;;  %606 = vmatprep.subr.bf16.mxu1 %v702_v0 }
  0x3d   : > { %587 = vmatpush3.bf16.msra.mxu0 %v645_v7  ;;  %607 = vmatpush3.bf16.msra.mxu1 %v653_v14 }
  0x3e   : > { %588 = vmatprep.subr.bf16.mxu0 %v702_v0  ;;  %608 = vmatprep.subr.bf16.mxu1 %v702_v0 }
  0x41   : > { %589 = vmatpush3.bf16.msra.mxu0 %v646_v9  ;;  %609 = vmatpush3.bf16.msra.mxu1 %v654_v15 }
  0x42   : > { %590 = vmatprep.subr.bf16.mxu0 %v702_v0  ;;  %610 = vmatprep.subr.bf16.mxu1 %v702_v0 }
  0x45   : > { %591 = vmatpush3.bf16.msra.mxu0 %v647_v10  ;;  %611 = vmatpush3.bf16.msra.mxu1 %v655_v16 }
  0x46   : > { %592 = vmatprep.subr.bf16.mxu0 %v702_v0  ;;  %612 = vmatprep.subr.bf16.mxu1 %v702_v0 }
  0x49   : > { %593 = vmatpush3.bf16.msra.mxu0 %v648_v11  ;;  %613 = vmatpush3.bf16.msra.mxu1 %v656_v17 }
  0x4c   : > { %595 = vmatmul.mubr.bf16.vlgmr.msra.gmra.mrb[0].mxu0 %v236_v12 }
 0x11f   : > { %v342_v19 = vpop.f32.mrb[0].mxu0 }
 0x120   : > { %v343_v20 = vadd.f32 %v540_v18, %v342_v19  ;;  %v596_v21 = vpop.f32.mrb[1].mxu0 }
 0x121   : > { %v345_v22 = vpop.f32.mrb[2].mxu0 }
 0x122   : > { %v349_v23 = vmul.f32 0.70710677, %v343_v20  ;;  %v597_v24 = vpop.f32.mrb[3].mxu0  ;;  %v348_v26 = vmul.f32 0.5, %v343_v20 }
 0x124   : > { %657 = verf.f32 %v349_v23 }
 0x12e   : > { %v658_v25 = vpop.eup %657 }
 0x12f   : > { %v351_v27 = vadd.f32 1.0, %v658_v25 }
 0x131   : > { %v352_v28 = vmul.f32 %v351_v27, %v348_v26 }
 0x133   : > { %v353_v29 = vpack.c.bf16 %v352_v28, %v352_v28 }
 0x135   : > { %615 = vmatmul.mubr.bf16.vlgmr.msra.gmra.mrb[0].mxu1 %v353_v29 }
 0x208   : > { %v459_v31 = vpop.f32.mrb[0].mxu1 }
 0x209   : > { %v460_v32 = vadd.f32 %v549_v30, %v459_v31  ;;  %v616_v33 = vpop.f32.mrb[1].mxu1 }
 0x20a   : > { %v462_v34 = vpop.f32.mrb[2].mxu1 }
 0x20b   : > { %465 = vst [vmem:[%s234_s15] sm:$0xff] %v460_v32  ;;  %v617_v35 = vpop.f32.mrb[3].mxu1 }
 0x20c PF: > { %s16_s18 = sadd.s32 1, %s697_s18  }
 0x20d   : > { %p13_p3 = scmp.ge.s32.totalorder %s16_s18, 4  }
 0x20f   :  { %15 = sbr.rel (!%p13_p3) target bundleno = 1 (0x1), region = 75 }
 0x216   :  { %485 = vsyncpa [#allocation3], 1 }
 0x217   :  { %487 = vsyncpa [#allocation3 + $0x1], 1 }

</bundles_post_ra>
